<compile_context>
chip_gen: v7x
topology: tpu7x:2x2x1
jax: 0.10.0
libtpu: 0.0.40
codegen_flags: <defaults>
</compile_context>

<pallas_src>
import functools

import jax
import jax.numpy as jnp
from jax.experimental import pallas as pl
from jax.experimental.pallas import tpu as pltpu

_BIG = 1e30  # sentinel; |gram| of unit vectors <= 1, clamped squared dists <= 4


def _triplet_kernel(vsi_ref, vsjt_ref, tcol_ref, trow_ref, hinge_ref,
                    gpos_ref, gneg_ref, *, margin):
    """One (anchor-block i, candidate-block j) grid step."""
    j = pl.program_id(1)
    nj = pl.num_programs(1)

    # ---- init running Gram extrema once per anchor block (first j step) -----
    @pl.when(j == 0)
    def _():
        gpos_ref[...] = jnp.full_like(gpos_ref, jnp.float32(_BIG))    # running min(gram) over positives
        gneg_ref[...] = jnp.full_like(gneg_ref, jnp.float32(-_BIG))   # running max(gram) over negatives

    # ---- Gram tile on the MXU (inputs pre-normalized & pre-transposed) ------
    gram = jnp.dot(vsi_ref[...], vsjt_ref[...],
                   preferred_element_type=jnp.float32)                # (tb, tb) f32

    # dist = 2 - 2*gram is monotone decreasing in gram, so:
    #   hardest positive (max dist)  == min gram over same-label columns
    #   hardest negative (min dist)  == max gram over diff-label columns
    tcol = tcol_ref[...]                                              # (tb, 1)  anchor labels (-1 = pad)
    trow = trow_ref[...]                                              # (1, tb)  candidate labels (-1 = pad)
    same = tcol == trow
    neg = jnp.logical_and(jnp.logical_not(same), trow >= 0)

    gpos_ref[...] = jnp.minimum(
        gpos_ref[...],
        jnp.min(jnp.where(same, gram, jnp.float32(_BIG)), axis=1, keepdims=True))
    gneg_ref[...] = jnp.maximum(
        gneg_ref[...],
        jnp.max(jnp.where(neg, gram, jnp.float32(-_BIG)), axis=1, keepdims=True))

    # ---- finalize per-anchor hinge once per anchor block (last j step) ------
    @pl.when(j == nj - 1)
    def _():
        # Apply the 2 - 2*g conversion and the reference 1e-12 clamp only here.
        dp = jnp.maximum(2.0 - 2.0 * gpos_ref[...], jnp.float32(1e-12))
        dn = jnp.maximum(2.0 - 2.0 * gneg_ref[...], jnp.float32(1e-12))
        hinge = jnp.maximum(dp - dn + jnp.float32(margin), 0.0)
        # Padded anchor rows (label == -1) contribute exactly zero to the mean.
        hinge_ref[...] = jnp.where(tcol_ref[...] >= 0, hinge, jnp.float32(0.0))


def _round_up(x, m):
    return ((x + m - 1) // m) * m


def hard_batch_mining_triplet_loss(inputs, targets, margin=0.3,
                                   tile_b=512, use_bf16_gram=False):
    """inputs: (B, D) float embeddings; targets: (B,) int labels. Returns scalar loss."""
    B, D = inputs.shape
    gram_dtype = jnp.bfloat16 if use_bf16_gram else jnp.float32
    isz = jnp.dtype(gram_dtype).itemsize

    # Tile geometry: feature dim padded to MXU lanes (128); row tile lane-aligned
    # (multiple of 128) unless the whole (8-padded) batch fits in one block.
    D_pad = _round_up(max(D, 128), 128)
    B8 = _round_up(B, 8)
    if B8 <= tile_b:
        tb = B8
    else:
        tb = _round_up(tile_b, 128)
    B_pad = _round_up(B8, tb)
    ni = B_pad // tb
    nj = B_pad // tb

    # Zero-pad; padded rows get a unit embedding so the (eps-free) normalization
    # stays finite. They are excluded from mining and from the mean via label -1.
    x = jnp.zeros((B_pad, D_pad), jnp.float32).at[:B, :D].set(inputs.astype(jnp.float32))
    if B_pad > B:
        x = x.at[B:, 0].set(1.0)

    # Normalization hoisted out of the kernel: one O(B*D) pass instead of
    # re-normalizing every candidate block ni times inside the j-loop.
    vs = (x / jnp.sqrt(jnp.sum(x * x, axis=1, keepdims=True))).astype(gram_dtype)
    vs_t = vs.T   # candidates pre-transposed -> canonical (M,K)x(K,N) matmul on the MXU

    # Labels shifted to be non-negative so -1 marks padding; this folds row and
    # column validity into the label streams (no separate validity inputs/compares).
    t = targets.astype(jnp.int32)
    t = t - jnp.min(t)
    t_pad = jnp.full((B_pad,), -1, dtype=jnp.int32).at[:B].set(t)
    tcol = t_pad.reshape(B_pad, 1)
    trow = t_pad.reshape(1, B_pad)

    # VMEM sized from the tile geometry (NOT a blanket 64 MiB, which is the entire
    # v7x per-TC VMEM): double-buffered anchor + candidate tiles, (tb,tb) elementwise
    # temporaries (gram + masks + selects), plus small label/output/scratch streams.
    tile_bytes = tb * D_pad * isz
    vmem_est = 2 * 2 * tile_bytes + 8 * tb * tb * 4 + 64 * tb
    vmem_limit = int(min(48 * 1024 * 1024,
                         max(16 * 1024 * 1024, vmem_est + (4 << 20))))

    cost = pl.CostEstimate(
        flops=2 * B_pad * B_pad * D_pad,
        transcendentals=0,
        bytes_accessed=(ni * nj + ni) * tb * D_pad * isz + 8 * B_pad + 4 * B_pad,
    )

    hinge = pl.pallas_call(
        functools.partial(_triplet_kernel, margin=float(margin)),
        out_shape=jax.ShapeDtypeStruct((B_pad, 1), jnp.float32),
        grid_spec=pltpu.PrefetchScalarGridSpec(
            num_scalar_prefetch=0,
            grid=(ni, nj),
            in_specs=[
                # anchor rows: index map invariant in j -> stays resident across the j loop
                pl.BlockSpec((tb, D_pad), lambda i, j: (i, 0)),
                # candidate columns (pre-transposed, streamed over j)
                # TODO(synk): on v5e, pipeline_mode=pl.Buffered(3) here if xprof shows
                # the wrap-around candidate fetch exposed at i-block boundaries.
                pl.BlockSpec((D_pad, tb), lambda i, j: (0, j)),
                pl.BlockSpec((tb, 1), lambda i, j: (i, 0)),   # anchor labels (-1 = pad)
                pl.BlockSpec((1, tb), lambda i, j: (0, j)),   # candidate labels (-1 = pad)
            ],
            out_specs=pl.BlockSpec((tb, 1), lambda i, j: (i, 0)),
            scratch_shapes=[
                pltpu.VMEM((tb, 1), jnp.float32),   # running min(gram) over positives
                pltpu.VMEM((tb, 1), jnp.float32),   # running max(gram) over negatives
            ],
        ),
        compiler_params=pltpu.CompilerParams(
            dimension_semantics=("parallel", "arbitrary"),
            vmem_limit_bytes=vmem_limit,
        ),
        cost_estimate=cost,
    )(vs, vs_t, tcol, trow)

    # MarginRankingLoss(reduction='mean') over the real batch only
    # (padded anchors were zeroed in-kernel).
    return jnp.sum(hinge) / jnp.float32(B)


if __name__ == "__main__":
    key = jax.random.PRNGKey(0)
    B, D = 8, 32
    inputs = jax.random.normal(key, (B, D), dtype=jnp.float32)
    # 4 classes, 2 samples each (every anchor has a positive and a negative).
    targets = jnp.array([0, 0, 1, 1, 2, 2, 3, 3], dtype=jnp.int32)

    loss = hard_batch_mining_triplet_loss(inputs, targets, margin=0.3)
    jax.block_until_ready(loss)
    print("KERNEL_OK")
</pallas_src>

<mosaic_0001>
module attributes {stable_mosaic.version = 11 : i64} {
  func.func @_triplet_kernel(%arg0: i32, %arg1: i32, %arg2: memref<8x128xf32, #tpu.memory_space<vmem>>, %arg3: memref<128x8xf32, #tpu.memory_space<vmem>>, %arg4: memref<8x1xi32, #tpu.memory_space<vmem>>, %arg5: memref<1x8xi32, #tpu.memory_space<vmem>>, %arg6: memref<8x1xf32, #tpu.memory_space<vmem>>, %arg7: memref<8x1xf32, #tpu.memory_space<vmem>>, %arg8: memref<8x1xf32, #tpu.memory_space<vmem>>) attributes {dimension_semantics = [#tpu.dimension_semantics<parallel>, #tpu.dimension_semantics<arbitrary>], iteration_bounds = array<i64: 1, 1>, scalar_prefetch = 0 : i64, scratch_operands = 2 : i64, tpu.core_type = #tpu.core_type<tc>, window_params = [{transform_indices = @transform_0, window_bounds = array<i64: 8, 128>}, {transform_indices = @transform_1, window_bounds = array<i64: 128, 8>}, {transform_indices = @transform_2, window_bounds = array<i64: 8, 1>}, {transform_indices = @transform_3, window_bounds = array<i64: 1, 8>}, {transform_indices = @transform_4, window_bounds = array<i64: 8, 1>}]} {
    %c0_i32 = arith.constant 0 : i32
    %0 = arith.cmpi eq, %arg1, %c0_i32 : i32
    %1 = arith.extui %0 : i1 to i32
    %c0_i32_0 = arith.constant 0 : i32
    %2 = arith.cmpi ne, %1, %c0_i32_0 : i32
    scf.if %2 {
      %cst_24 = arith.constant 1.000000e+30 : f32
      %33 = vector.broadcast %cst_24 : f32 to vector<8x1xf32>
      %c0_25 = arith.constant 0 : index
      %c0_26 = arith.constant 0 : index
      %34 = vector.load %arg7[%c0_25, %c0_26] : memref<8x1xf32, #tpu.memory_space<vmem>>, vector<8x1xf32>
      tpu.vector_store %arg7[%c0_25, %c0_26], %33 {strides = array<i32>} : memref<8x1xf32, #tpu.memory_space<vmem>>, vector<8x1xf32>,
      %cst_27 = arith.constant -1.000000e+30 : f32
      %35 = vector.broadcast %cst_27 : f32 to vector<8x1xf32>
      %c0_28 = arith.constant 0 : index
      %c0_29 = arith.constant 0 : index
      %36 = vector.load %arg8[%c0_28, %c0_29] : memref<8x1xf32, #tpu.memory_space<vmem>>, vector<8x1xf32>
      tpu.vector_store %arg8[%c0_28, %c0_29], %35 {strides = array<i32>} : memref<8x1xf32, #tpu.memory_space<vmem>>, vector<8x1xf32>,
    } else {
    }
    %c0 = arith.constant 0 : index
    %c0_1 = arith.constant 0 : index
    %3 = vector.load %arg2[%c0, %c0_1] : memref<8x128xf32, #tpu.memory_space<vmem>>, vector<8x128xf32>
    %c0_2 = arith.constant 0 : index
    %c0_3 = arith.constant 0 : index
    %4 = vector.load %arg3[%c0_2, %c0_3] : memref<128x8xf32, #tpu.memory_space<vmem>>, vector<128x8xf32>
    %cst = arith.constant dense<0.000000e+00> : vector<8x8xf32>
    %5 = tpu.matmul %3, %4, %cst {dimension_numbers = #tpu.dot_dimension_numbers<[1], [0], [0], [1], [0, 0, 1, 1], [], []>} : vector<8x128xf32>, vector<128x8xf32>, vector<8x8xf32> -> vector<8x8xf32>
    %c0_4 = arith.constant 0 : index
    %c0_5 = arith.constant 0 : index
    %6 = vector.load %arg4[%c0_4, %c0_5] : memref<8x1xi32, #tpu.memory_space<vmem>>, vector<8x1xi32>
    %c0_6 = arith.constant 0 : index
    %c0_7 = arith.constant 0 : index
    %7 = vector.load %arg5[%c0_6, %c0_7] : memref<1x8xi32, #tpu.memory_space<vmem>>, vector<1x8xi32>
    %8 = vector.broadcast %6 : vector<8x1xi32> to vector<8x8xi32>
    %9 = vector.broadcast %7 : vector<1x8xi32> to vector<8x8xi32>
    %10 = arith.cmpi eq, %8, %9 : vector<8x8xi32>
    %cst_8 = arith.constant dense<true> : vector<8x8xi1>
    %11 = arith.xori %10, %cst_8 : vector<8x8xi1>
    %c0_i32_9 = arith.constant 0 : i32
    %12 = vector.broadcast %c0_i32_9 : i32 to vector<1x8xi32>
    %13 = arith.cmpi sge, %7, %12 : vector<1x8xi32>
    %14 = vector.broadcast %13 : vector<1x8xi1> to vector<8x8xi1>
    %15 = arith.andi %11, %14 : vector<8x8xi1>
    %c0_10 = arith.constant 0 : index
    %c0_11 = arith.constant 0 : index
    %16 = vector.load %arg7[%c0_10, %c0_11] : memref<8x1xf32, #tpu.memory_space<vmem>>, vector<8x1xf32>
    %cst_12 = arith.constant 1.000000e+30 : f32
    %17 = vector.broadcast %cst_12 : f32 to vector<8x8xf32>
    %18 = arith.select %10, %5, %17 : vector<8x8xi1>, vector<8x8xf32>
    %cst_13 = arith.constant dense<0x7F800000> : vector<8xf32>
    %19 = vector.multi_reduction <minimumf>, %18, %cst_13 [1] : vector<8x8xf32> to vector<8xf32>
    %20 = vector.shape_cast %19 : vector<8xf32> to vector<8x1xf32>
    %21 = arith.minimumf %16, %20 : vector<8x1xf32>
    %c0_14 = arith.constant 0 : index
    %c0_15 = arith.constant 0 : index
    %22 = vector.load %arg7[%c0_14, %c0_15] : memref<8x1xf32, #tpu.memory_space<vmem>>, vector<8x1xf32>
    tpu.vector_store %arg7[%c0_14, %c0_15], %21 {strides = array<i32>} : memref<8x1xf32, #tpu.memory_space<vmem>>, vector<8x1xf32>,
    %c0_16 = arith.constant 0 : index
    %c0_17 = arith.constant 0 : index
    %23 = vector.load %arg8[%c0_16, %c0_17] : memref<8x1xf32, #tpu.memory_space<vmem>>, vector<8x1xf32>
    %cst_18 = arith.constant -1.000000e+30 : f32
    %24 = vector.broadcast %cst_18 : f32 to vector<8x8xf32>
    %25 = arith.select %15, %5, %24 : vector<8x8xi1>, vector<8x8xf32>
    %cst_19 = arith.constant dense<0xFF800000> : vector<8xf32>
    %26 = vector.multi_reduction <maximumf>, %25, %cst_19 [1] : vector<8x8xf32> to vector<8xf32>
    %27 = vector.shape_cast %26 : vector<8xf32> to vector<8x1xf32>
    %28 = arith.maximumf %23, %27 : vector<8x1xf32>
    %c0_20 = arith.constant 0 : index
    %c0_21 = arith.constant 0 : index
    %29 = vector.load %arg8[%c0_20, %c0_21] : memref<8x1xf32, #tpu.memory_space<vmem>>, vector<8x1xf32>
    tpu.vector_store %arg8[%c0_20, %c0_21], %28 {strides = array<i32>} : memref<8x1xf32, #tpu.memory_space<vmem>>, vector<8x1xf32>,
    %c0_i32_22 = arith.constant 0 : i32
    %30 = arith.cmpi eq, %arg1, %c0_i32_22 : i32
    %31 = arith.extui %30 : i1 to i32
    %c0_i32_23 = arith.constant 0 : i32
    %32 = arith.cmpi ne, %31, %c0_i32_23 : i32
    scf.if %32 {
      %c0_24 = arith.constant 0 : index
      %c0_25 = arith.constant 0 : index
      %33 = vector.load %arg7[%c0_24, %c0_25] : memref<8x1xf32, #tpu.memory_space<vmem>>, vector<8x1xf32>
      %cst_26 = arith.constant 2.000000e+00 : f32
      %34 = vector.broadcast %cst_26 : f32 to vector<8x1xf32>
      %35 = arith.mulf %34, %33 : vector<8x1xf32>
      %cst_27 = arith.constant 2.000000e+00 : f32
      %36 = vector.broadcast %cst_27 : f32 to vector<8x1xf32>
      %37 = arith.subf %36, %35 : vector<8x1xf32>
      %cst_28 = arith.constant 9.99999996E-13 : f32
      %38 = vector.broadcast %cst_28 : f32 to vector<8x1xf32>
      %39 = arith.maximumf %37, %38 : vector<8x1xf32>
      %c0_29 = arith.constant 0 : index
      %c0_30 = arith.constant 0 : index
      %40 = vector.load %arg8[%c0_29, %c0_30] : memref<8x1xf32, #tpu.memory_space<vmem>>, vector<8x1xf32>
      %cst_31 = arith.constant 2.000000e+00 : f32
      %41 = vector.broadcast %cst_31 : f32 to vector<8x1xf32>
      %42 = arith.mulf %41, %40 : vector<8x1xf32>
      %cst_32 = arith.constant 2.000000e+00 : f32
      %43 = vector.broadcast %cst_32 : f32 to vector<8x1xf32>
      %44 = arith.subf %43, %42 : vector<8x1xf32>
      %cst_33 = arith.constant 9.99999996E-13 : f32
      %45 = vector.broadcast %cst_33 : f32 to vector<8x1xf32>
      %46 = arith.maximumf %44, %45 : vector<8x1xf32>
      %47 = arith.subf %39, %46 : vector<8x1xf32>
      %cst_34 = arith.constant 3.000000e-01 : f32
      %48 = vector.broadcast %cst_34 : f32 to vector<8x1xf32>
      %49 = arith.addf %47, %48 : vector<8x1xf32>
      %cst_35 = arith.constant 0.000000e+00 : f32
      %50 = vector.broadcast %cst_35 : f32 to vector<8x1xf32>
      %51 = arith.maximumf %49, %50 : vector<8x1xf32>
      %c0_36 = arith.constant 0 : index
      %c0_37 = arith.constant 0 : index
      %52 = vector.load %arg4[%c0_36, %c0_37] : memref<8x1xi32, #tpu.memory_space<vmem>>, vector<8x1xi32>
      %c0_i32_38 = arith.constant 0 : i32
      %53 = vector.broadcast %c0_i32_38 : i32 to vector<8x1xi32>
      %54 = arith.cmpi sge, %52, %53 : vector<8x1xi32>
      %cst_39 = arith.constant 0.000000e+00 : f32
      %55 = vector.broadcast %cst_39 : f32 to vector<8x1xf32>
      %56 = arith.select %54, %51, %55 : vector<8x1xi1>, vector<8x1xf32>
      %c0_40 = arith.constant 0 : index
      %c0_41 = arith.constant 0 : index
      %57 = vector.load %arg6[%c0_40, %c0_41] : memref<8x1xf32, #tpu.memory_space<vmem>>, vector<8x1xf32>
      tpu.vector_store %arg6[%c0_40, %c0_41], %56 {strides = array<i32>} : memref<8x1xf32, #tpu.memory_space<vmem>>, vector<8x1xf32>,
    } else {
    }
    return
  }
  func.func @transform_0(%arg0: i32, %arg1: i32) -> (i32, i32) {
    %c0_i32 = arith.constant 0 : i32
    %c0_i32_0 = arith.constant 0 : i32
    return %arg0, %c0_i32 : i32, i32
  }
  func.func @transform_1(%arg0: i32, %arg1: i32) -> (i32, i32) {
    %c0_i32 = arith.constant 0 : i32
    %c0_i32_0 = arith.constant 0 : i32
    return %c0_i32, %arg1 : i32, i32
  }
  func.func @transform_2(%arg0: i32, %arg1: i32) -> (i32, i32) {
    %c0_i32 = arith.constant 0 : i32
    %c0_i32_0 = arith.constant 0 : i32
    return %arg0, %c0_i32 : i32, i32
  }
  func.func @transform_3(%arg0: i32, %arg1: i32) -> (i32, i32) {
    %c0_i32 = arith.constant 0 : i32
    %c0_i32_0 = arith.constant 0 : i32
    return %c0_i32, %arg1 : i32, i32
  }
  func.func @transform_4(%arg0: i32, %arg1: i32) -> (i32, i32) {
    %c0_i32 = arith.constant 0 : i32
    %c0_i32_0 = arith.constant 0 : i32
    return %arg0, %c0_i32 : i32, i32
  }
}

</mosaic_0001>

<bundles_post_ra>
// kernel: tpu_custom_call.1
= control target key start
LH: loop header
LB: loop body
LE: loop exit
PB: predicated region body
PF: predicated region fallthrough
CT: control target
= control target key end

     0   :  { %v252_v0 = vmov 0.0|0.0   ;;  %vm253_vm0 = vmmov 0   ;;  %v254_v4 = vmov 0.0   ;;  %v255_v7 = vmov 0   ;;  %s353_s1 = inlined_call_operand.vmem [shape: f32[128,8], index: 1, kind: input, shape index: {}]   ;;  %s354_s2 = inlined_call_operand.vmem [shape: s32[8,1], index: 2, kind: input, shape index: {}]   ;;  %s355_s0 = inlined_call_operand.vmem [shape: f32[8,128], index: 0, kind: input, shape index: {}]   ;;  %s356_s3 = inlined_call_operand.vmem [shape: s32[1,8], index: 3, kind: input, shape index: {}]   ;;  %s357_s4 = inlined_call_operand.vmem [shape: f32[8,1], index: 4, kind: output, shape index: {}]  }
   0x1   :  { %220 = vmatprep.subr.bf16.mxu0 %v252_v0  ;;  %v25_v1 = vld [vmem:[%s353_s1] sm:$0xff]  ;;  %v26_v2 = vld [vmem:[%s353_s1 + $0x8] sm:$0xff]  ;;  %v27_v3 = vld [vmem:[%s353_s1 + $0x10] sm:$0xff]  ;;  %217 = vmatprep.mubr.msk.f32.mxu0 %vm253_vm0, %v254_v4  ;;  %vm21_vm1 = vcmask 7168   ;;  %v256_v29 = vmov -1e+30   ;;  %v116_v30 = vlaneseq }
   0x2   :  { %v221_v5 = vpack.c.bf16 %v26_v2, %v25_v1  ;;  %v28_v6 = vld [vmem:[%s353_s1 + $0x18] sm:$0xff]  ;;  %251 = vset.pattern.permute.xlu0 %v255_v7  ;;  %v29_v9 = vld [vmem:[%s353_s1 + $0x20] sm:$0xff]  ;;  %v30_v10 = vld [vmem:[%s353_s1 + $0x28] sm:$0xff]  ;;  %23 = vst.msk [vmem:[#allocation3] sm:$0xff] %vm21_vm1, %v256_v29  ;;  %vm257_vm4 = vmmov 1   ;;  %vm132_vm8 = vcmask 64512  }
   0x3   :  { %v224_v8 = vpack.c.bf16 %v28_v6, %v27_v3  ;;  %v305_v11 = vld [vmem:[%s354_s2] sm:$0xff]  ;;  %v227_v12 = vpack.c.bf16 %v30_v10, %v29_v9  ;;  %v31_v13 = vld [vmem:[%s353_s1 + $0x30] sm:$0xff]  ;;  %v32_v14 = vld [vmem:[%s353_s1 + $0x38] sm:$0xff]  ;;  %v117_v31 = vshrl.u32 %v116_v30, 7  ;;  %v258_v44 = vmov 1e+30  }
   0x4   :  { %222 = vmatpush3.bf16.msra.mxu0 %v221_v5  ;;  %114 = vperm.xlu0 %251, %v305_v11   ;;  %v230_v15 = vpack.c.bf16 %v32_v14, %v31_v13  ;;  %v33_v16 = vld [vmem:[%s353_s1 + $0x40] sm:$0xff]  ;;  %v34_v17 = vld [vmem:[%s353_s1 + $0x48] sm:$0xff]  ;;  %v35_v19 = vld [vmem:[%s353_s1 + $0x50] sm:$0xff]  ;;  %22 = vst.msk [vmem:[#allocation2] sm:$0xff] %vm21_vm1, %v258_v44  ;;  %vm161_vm9 = vcmp.ge.s32.totalorder %v305_v11, 0 }
   0x5   :  { %223 = vmatprep.subr.bf16.mxu0 %v252_v0  ;;  %v233_v18 = vpack.c.bf16 %v34_v17, %v33_v16  ;;  %v36_v20 = vld [vmem:[%s353_s1 + $0x58] sm:$0xff]  ;;  %v37_v22 = vld [vmem:[%s353_s1 + $0x60] sm:$0xff]  ;;  %v38_v23 = vld [vmem:[%s353_s1 + $0x68] sm:$0xff]  ;;  %v118_v33 = vsub.s32 0, %v117_v31 }
   0x6   :  { %v236_v21 = vpack.c.bf16 %v36_v20, %v35_v19  ;;  %v239_v24 = vpack.c.bf16 %v38_v23, %v37_v22  ;;  %v39_v25 = vld [vmem:[%s353_s1 + $0x70] sm:$0xff]  ;;  %v40_v26 = vld [vmem:[%s353_s1 + $0x78] sm:$0xff]  ;;  %v24_v28 = vld [vmem:[%s355_s0] sm:$0xff] }
   0x7   :  { %v242_v27 = vpack.c.bf16 %v40_v26, %v39_v25  ;;  %v112_v32 = vld [vmem:[%s356_s3] sm:$0x1] }
   0x8   :  { %225 = vmatpush3.bf16.msra.mxu0 %v224_v8  ;;  %vm122_vm2 = vcmp.ge.s32.totalorder %v112_v32, 0  ;;  %v119_v35 = vrot.slane %v112_v32, %v118_v33 }
   0x9   :  { %226 = vmatprep.subr.bf16.mxu0 %v252_v0  ;;  %v123_v34 = vsel %vm122_vm2, 1, %v255_v7  ;;  %v139_v45 = vld [vmem:[#allocation3] sm:$0xff] }
   0xa   :  { %v127_v37 = vrot.slane %v123_v34, %v118_v33 }
   0xb   :  { %v130_v46 = vld [vmem:[#allocation2] sm:$0xff] }
   0xc   :  { %228 = vmatpush3.bf16.msra.mxu0 %v227_v12  ;;  %vm128_vm6 = vcmp.eq.s32.totalorder %v127_v37, 1 }
   0xd   :  { %229 = vmatprep.subr.bf16.mxu0 %v252_v0 }
  0x10   :  { %231 = vmatpush3.bf16.msra.mxu0 %v230_v15 }
  0x11   :  { %232 = vmatprep.subr.bf16.mxu0 %v252_v0 }
  0x14   :  { %234 = vmatpush3.bf16.msra.mxu0 %v233_v18 }
  0x15   :  { %235 = vmatprep.subr.bf16.mxu0 %v252_v0 }
  0x18   :  { %237 = vmatpush3.bf16.msra.mxu0 %v236_v21 }
  0x19   :  { %238 = vmatprep.subr.bf16.mxu0 %v252_v0 }
  0x1c   :  { %240 = vmatpush3.bf16.msra.mxu0 %v239_v24 }
  0x1d   :  { %241 = vmatprep.subr.bf16.mxu0 %v252_v0 }
  0x20   :  { %243 = vmatpush3.bf16.msra.mxu0 %v242_v27 }
  0x23   :  { %218 = vmatmul.mubr.f32.vlgmr.msra.gmra.mrb[0].mxu0 %v24_v28 }
  0x83   :  { %v115_v36 = vpop.permute.xlu0 %114 }
  0x84   :  { %vm120_vm3 = vcmp.eq.s32.totalorder %v115_v36, %v119_v35 }
  0x85   :  { %vm121_vm5 = vmxor %vm120_vm3, %vm257_vm4 }
  0x86   :  { %vm129_vm7 = vmand %vm121_vm5, %vm128_vm6 }
  0xf6   :  { %v107_v38 = vpop.f32.mrb[0].mxu0 }
  0xf7   :  { %v219_v39 = vpop.f32.mrb[1].mxu0  ;;  %v140_v40 = vsel %vm129_vm7, %v107_v38, -1e+30  ;;  %v131_v41 = vsel %vm120_vm3, %v107_v38, 1e+30 }
  0xf8   :  { %v141_v42 = vsel %vm132_vm8, %v140_v40, -inf  ;;  %v133_v43 = vsel %vm132_vm8, %v131_v41, inf }
  0xf9   :  { %142 = vmax.xlane.f32.xlu1 %v141_v42  ;;  %134 = vmin.xlane.f32.xlu0 %v133_v43 }
 0x186   :  { %v143_v47 = vpop.xlane.xlu1 %142  ;;  %v135_v48 = vpop.xlane.xlu0 %134 }
 0x187   :  { %v144_v49 = vmax.f32 %v139_v45, %v143_v47  ;;  %v136_v50 = vmin.f32 %v130_v46, %v135_v48 }
 0x189   :  { %145 = vst.msk [vmem:[#allocation3] sm:$0xff] %vm21_vm1, %v144_v49  ;;  %138 = vst.msk [vmem:[#allocation2] sm:$0xff] %vm21_vm1, %v136_v50 }
 0x190   :  { %v153_v51 = vld [vmem:[#allocation3] sm:$0xff]  ;;  %v149_v52 = vld [vmem:[#allocation2] sm:$0xff] }
 0x191   :  { %v154_v53 = vmul.f32 2.0, %v153_v51  ;;  %v150_v54 = vmul.f32 2.0, %v149_v52 }
 0x193   :  { %v155_v55 = vsub.f32 2.0, %v154_v53  ;;  %v151_v56 = vsub.f32 2.0, %v150_v54 }
 0x195   :  { %v156_v57 = vmax.f32 %v155_v55, 1e-12  ;;  %v152_v58 = vmax.f32 %v151_v56, 1e-12 }
 0x197   :  { %v157_v59 = vsub.f32 %v152_v58, %v156_v57 }
 0x199   :  { %v158_v60 = vadd.f32 0.3, %v157_v59 }
 0x19b   :  { %v159_v61 = vmax.f32 %v158_v60, 0.0 }
 0x19d   :  { %v162_v62 = vsel %vm161_vm9, %v159_v61, 0.0 }
 0x19e   :  { %163 = vst.msk [vmem:[%s357_s4] sm:$0xff] %vm21_vm1, %v162_v62 }

</bundles_post_ra>
